<compile_context>
chip_gen: v5e
topology: v5e:2x2
jax: 0.10.0
libtpu: 0.0.40
codegen_flags: <defaults>
</compile_context>

<pallas_src>
import math

import jax
import jax.numpy as jnp
from jax import lax
from jax.experimental import pallas as pl
from jax.experimental.pallas import tpu as pltpu

_SQRT_2_OVER_PI = math.sqrt(2.0 / math.pi)


def _new_gelu(x):
    # 0.5 * x * (1 + tanh(sqrt(2/pi) * (x + 0.044715 * x**3)))
    return 0.5 * x * (1.0 + jnp.tanh(_SQRT_2_OVER_PI * (x + 0.044715 * (x * x * x))))


def _round_up(n, m):
    return ((n + m - 1) // m) * m


def mlp_kernel(x_ref, w1_ref, b1_ref, w2_ref, b2_ref, o_ref, acc_ref):
    # x_ref : (TILE_R, Hp)     w1_ref: (TILE_I, Hp)   b1_ref: (1, TILE_I)
    # w2_ref: (Hp, TILE_I)     b2_ref: (1, Hp)        o_ref : (TILE_R, Hp)
    # acc_ref: (TILE_R, Hp) f32 accumulator, resident across the I axis.
    k = pl.program_id(1)

    @pl.when(k == 0)
    def _():
        acc_ref[...] = jnp.zeros_like(acc_ref)

    # dense_1 slab: contract H with H  ->  (TILE_R, TILE_I)  (== x @ w1.T)
    x = x_ref[...].astype(jnp.bfloat16)
    w1 = w1_ref[...].astype(jnp.bfloat16)
    h = lax.dot_general(x, w1, (((1,), (1,)), ((), ())),
                        preferred_element_type=jnp.float32)
    h = h + b1_ref[...]

    # NewGELU in f32 (VPU + EUP tanh).
    g = _new_gelu(h)

    # partial dense_2: contract I-tile with I-tile -> (TILE_R, Hp)  (== g @ w2.T)
    w2 = w2_ref[...].astype(jnp.bfloat16)
    acc_ref[...] += lax.dot_general(g.astype(jnp.bfloat16), w2,
                                    (((1,), (1,)), ((), ())),
                                    preferred_element_type=jnp.float32)

    @pl.when(k == pl.num_programs(1) - 1)
    def _():
        # dropout: eval-mode identity.
        # TODO(synk): training-mode dropout would use pltpu.prng_seed +
        # pltpu.stateful_bernoulli; omitted to match eval semantics.
        o_ref[...] = (acc_ref[...] + b2_ref[...]).astype(o_ref.dtype)


@jax.jit
def mlp_forward(x, w1, b1, w2, b2):
    """x: (B, S, H); w1: (I, H); b1: (I,); w2: (H, I); b2: (H,)  (PyTorch layout)."""
    B, S, H = x.shape
    I = w1.shape[0]
    rows = B * S

    # Lane-align H and I (128), sublane-align rows; no-op at production sizes.
    Hp = _round_up(H, 128)
    Ip = _round_up(I, 128)
    TILE_R = 256 if rows >= 256 else _round_up(rows, 8)
    rows_pad = _round_up(rows, TILE_R)
    TILE_I = next(t for t in (512, 256, 128) if Ip % t == 0)

    # Zero padding is exact: padded weight rows/cols and bias entries are 0,
    # gelu(0) = 0, so padded lanes contribute nothing and are sliced off below.
    x2d = jnp.pad(x.reshape(rows, H), ((0, rows_pad - rows), (0, Hp - H)))
    w1p = jnp.pad(w1, ((0, Ip - I), (0, Hp - H)))          # (Ip, Hp)
    b1p = jnp.pad(b1, (0, Ip - I)).reshape(1, Ip)
    w2p = jnp.pad(w2, ((0, Hp - H), (0, Ip - I)))          # (Hp, Ip)
    b2p = jnp.pad(b2, (0, Hp - H)).reshape(1, Hp)

    grid = (rows_pad // TILE_R, Ip // TILE_I)              # rows parallel, I reduction last

    cost = pl.CostEstimate(
        flops=4 * rows_pad * Hp * Ip,                      # two matmuls
        transcendentals=rows_pad * Ip,                     # tanh in NewGELU
        bytes_accessed=4 * (2 * rows_pad * Hp + 2 * Ip * Hp + Ip + Hp),
    )

    out = pl.pallas_call(
        mlp_kernel,
        out_shape=jax.ShapeDtypeStruct((rows_pad, Hp), x.dtype),
        grid_spec=pltpu.PrefetchScalarGridSpec(
            num_scalar_prefetch=0,
            grid=grid,
            in_specs=[
                pl.BlockSpec((TILE_R, Hp), lambda i, k: (i, 0)),   # x row tile
                pl.BlockSpec((TILE_I, Hp), lambda i, k: (k, 0)),   # w1 I-tile
                pl.BlockSpec((1, TILE_I), lambda i, k: (0, k)),    # b1 I-tile
                pl.BlockSpec((Hp, TILE_I), lambda i, k: (0, k)),   # w2 I-tile
                pl.BlockSpec((1, Hp), lambda i, k: (0, 0)),        # b2 (resident)
            ],
            out_specs=pl.BlockSpec((TILE_R, Hp), lambda i, k: (i, 0)),
            scratch_shapes=[pltpu.VMEM((TILE_R, Hp), jnp.float32)],
        ),
        compiler_params=pltpu.CompilerParams(
            dimension_semantics=("parallel", "arbitrary"),
        ),
        cost_estimate=cost,
    )(x2d, w1p, b1p, w2p, b2p)

    return out[:rows, :H].reshape(B, S, H)


def _reference(x, w1, b1, w2, b2):
    h = jnp.einsum("bsh,ih->bsi", x, w1) + b1
    g = _new_gelu(h)
    return jnp.einsum("bsi,hi->bsh", g, w2) + b2


if __name__ == "__main__":
    # Small config consistent with the module's __init__.
    config = dict(hidden_size=32, intermediate_size=128, hidden_dropout_prob=0.1)
    B, S = 2, 8
    H, I = config["hidden_size"], config["intermediate_size"]

    key = jax.random.PRNGKey(0)
    kx, k1, kb1, k2, kb2 = jax.random.split(key, 5)

    x = jax.random.normal(kx, (B, S, H), dtype=jnp.float32)
    # Deterministic parameter init (roughly nn.Linear's uniform fan-in scaling).
    w1 = jax.random.uniform(k1, (I, H), jnp.float32, -1.0, 1.0) / math.sqrt(H)
    b1 = jax.random.uniform(kb1, (I,), jnp.float32, -1.0, 1.0) / math.sqrt(H)
    w2 = jax.random.uniform(k2, (H, I), jnp.float32, -1.0, 1.0) / math.sqrt(I)
    b2 = jax.random.uniform(kb2, (H,), jnp.float32, -1.0, 1.0) / math.sqrt(I)

    y = jax.block_until_ready(mlp_forward(x, w1, b1, w2, b2))
    y_ref = _reference(x, w1, b1, w2, b2)

    assert y.shape == (B, S, H)
    # bf16 MXU operands with f32 accumulation -> loosened tolerance vs f32 ref.
    assert jnp.allclose(y, y_ref, atol=5e-2, rtol=5e-2), "mismatch vs reference"

    print("KERNEL_OK")
</pallas_src>

<mosaic_0001>
module attributes {stable_mosaic.version = 11 : i64} {
  func.func @mlp_kernel(%arg0: i32, %arg1: i32, %arg2: memref<16x128xf32, #tpu.memory_space<vmem>>, %arg3: memref<128x128xf32, #tpu.memory_space<vmem>>, %arg4: memref<1x128xf32, #tpu.memory_space<vmem>>, %arg5: memref<128x128xf32, #tpu.memory_space<vmem>>, %arg6: memref<1x128xf32, #tpu.memory_space<vmem>>, %arg7: memref<16x128xf32, #tpu.memory_space<vmem>>, %arg8: memref<16x128xf32, #tpu.memory_space<vmem>>) attributes {dimension_semantics = [#tpu.dimension_semantics<parallel>, #tpu.dimension_semantics<arbitrary>], iteration_bounds = array<i64: 1, 1>, scalar_prefetch = 0 : i64, scratch_operands = 1 : i64, tpu.core_type = #tpu.core_type<tc>, window_params = [{transform_indices = @transform_0, window_bounds = array<i64: 16, 128>}, {transform_indices = @transform_1, window_bounds = array<i64: 128, 128>}, {transform_indices = @transform_2, window_bounds = array<i64: 1, 128>}, {transform_indices = @transform_3, window_bounds = array<i64: 128, 128>}, {pipeline_mode = #tpu.pipeline_mode<synchronous>, transform_indices = @transform_4, window_bounds = array<i64: 1, 128>}, {transform_indices = @transform_5, window_bounds = array<i64: 16, 128>}]} {
    %c0_i32 = arith.constant 0 : i32
    %0 = arith.cmpi eq, %arg1, %c0_i32 : i32
    %1 = arith.extui %0 : i1 to i32
    %c0_i32_0 = arith.constant 0 : i32
    %2 = arith.cmpi ne, %1, %c0_i32_0 : i32
    scf.if %2 {
      %cst_19 = arith.constant 0.000000e+00 : f32
      %34 = vector.broadcast %cst_19 : f32 to vector<16x128xf32>
      %c0_20 = arith.constant 0 : index
      %c0_21 = arith.constant 0 : index
      %35 = vector.load %arg8[%c0_20, %c0_21] : memref<16x128xf32, #tpu.memory_space<vmem>>, vector<16x128xf32>
      tpu.vector_store %arg8[%c0_20, %c0_21], %34 {strides = array<i32>} : memref<16x128xf32, #tpu.memory_space<vmem>>, vector<16x128xf32>,
    } else {
    }
    %c0 = arith.constant 0 : index
    %c0_1 = arith.constant 0 : index
    %3 = vector.load %arg2[%c0, %c0_1] : memref<16x128xf32, #tpu.memory_space<vmem>>, vector<16x128xf32>
    %4 = arith.truncf %3 : vector<16x128xf32> to vector<16x128xbf16>
    %c0_2 = arith.constant 0 : index
    %c0_3 = arith.constant 0 : index
    %5 = vector.load %arg3[%c0_2, %c0_3] : memref<128x128xf32, #tpu.memory_space<vmem>>, vector<128x128xf32>
    %6 = arith.truncf %5 : vector<128x128xf32> to vector<128x128xbf16>
    %cst = arith.constant dense<0.000000e+00> : vector<16x128xf32>
    %7 = tpu.matmul %4, %6, %cst {dimension_numbers = #tpu.dot_dimension_numbers<[1], [1], [0], [0], [0, 0, 1, 0], [], []>} : vector<16x128xbf16>, vector<128x128xbf16>, vector<16x128xf32> -> vector<16x128xf32>
    %c0_4 = arith.constant 0 : index
    %c0_5 = arith.constant 0 : index
    %8 = vector.load %arg4[%c0_4, %c0_5] : memref<1x128xf32, #tpu.memory_space<vmem>>, vector<1x128xf32>
    %9 = vector.broadcast %8 : vector<1x128xf32> to vector<16x128xf32>
    %10 = arith.addf %7, %9 : vector<16x128xf32>
    %cst_6 = arith.constant 5.000000e-01 : f32
    %11 = vector.broadcast %cst_6 : f32 to vector<16x128xf32>
    %12 = arith.mulf %11, %10 : vector<16x128xf32>
    %13 = arith.mulf %10, %10 : vector<16x128xf32>
    %14 = arith.mulf %13, %10 : vector<16x128xf32>
    %cst_7 = arith.constant 4.471500e-02 : f32
    %15 = vector.broadcast %cst_7 : f32 to vector<16x128xf32>
    %16 = arith.mulf %15, %14 : vector<16x128xf32>
    %17 = arith.addf %10, %16 : vector<16x128xf32>
    %cst_8 = arith.constant 0.797884583 : f32
    %18 = vector.broadcast %cst_8 : f32 to vector<16x128xf32>
    %19 = arith.mulf %18, %17 : vector<16x128xf32>
    %20 = math.tanh %19 : vector<16x128xf32>
    %cst_9 = arith.constant 1.000000e+00 : f32
    %21 = vector.broadcast %cst_9 : f32 to vector<16x128xf32>
    %22 = arith.addf %21, %20 : vector<16x128xf32>
    %23 = arith.mulf %12, %22 : vector<16x128xf32>
    %c0_10 = arith.constant 0 : index
    %c0_11 = arith.constant 0 : index
    %24 = vector.load %arg5[%c0_10, %c0_11] : memref<128x128xf32, #tpu.memory_space<vmem>>, vector<128x128xf32>
    %25 = arith.truncf %24 : vector<128x128xf32> to vector<128x128xbf16>
    %c0_12 = arith.constant 0 : index
    %c0_13 = arith.constant 0 : index
    %26 = vector.load %arg8[%c0_12, %c0_13] : memref<16x128xf32, #tpu.memory_space<vmem>>, vector<16x128xf32>
    %27 = arith.truncf %23 : vector<16x128xf32> to vector<16x128xbf16>
    %cst_14 = arith.constant dense<0.000000e+00> : vector<16x128xf32>
    %28 = tpu.matmul %27, %25, %cst_14 {dimension_numbers = #tpu.dot_dimension_numbers<[1], [1], [0], [0], [0, 0, 1, 0], [], []>} : vector<16x128xbf16>, vector<128x128xbf16>, vector<16x128xf32> -> vector<16x128xf32>
    %29 = arith.addf %26, %28 : vector<16x128xf32>
    %c0_15 = arith.constant 0 : index
    %c0_16 = arith.constant 0 : index
    %30 = vector.load %arg8[%c0_15, %c0_16] : memref<16x128xf32, #tpu.memory_space<vmem>>, vector<16x128xf32>
    tpu.vector_store %arg8[%c0_15, %c0_16], %29 {strides = array<i32>} : memref<16x128xf32, #tpu.memory_space<vmem>>, vector<16x128xf32>,
    %c0_i32_17 = arith.constant 0 : i32
    %31 = arith.cmpi eq, %arg1, %c0_i32_17 : i32
    %32 = arith.extui %31 : i1 to i32
    %c0_i32_18 = arith.constant 0 : i32
    %33 = arith.cmpi ne, %32, %c0_i32_18 : i32
    scf.if %33 {
      %c0_19 = arith.constant 0 : index
      %c0_20 = arith.constant 0 : index
      %34 = vector.load %arg8[%c0_19, %c0_20] : memref<16x128xf32, #tpu.memory_space<vmem>>, vector<16x128xf32>
      %c0_21 = arith.constant 0 : index
      %c0_22 = arith.constant 0 : index
      %35 = vector.load %arg6[%c0_21, %c0_22] : memref<1x128xf32, #tpu.memory_space<vmem>>, vector<1x128xf32>
      %36 = vector.broadcast %35 : vector<1x128xf32> to vector<16x128xf32>
      %37 = arith.addf %34, %36 : vector<16x128xf32>
      %c0_23 = arith.constant 0 : index
      %c0_24 = arith.constant 0 : index
      %38 = vector.load %arg7[%c0_23, %c0_24] : memref<16x128xf32, #tpu.memory_space<vmem>>, vector<16x128xf32>
      tpu.vector_store %arg7[%c0_23, %c0_24], %37 {strides = array<i32>} : memref<16x128xf32, #tpu.memory_space<vmem>>, vector<16x128xf32>,
    } else {
    }
    return
  }
  func.func @transform_0(%arg0: i32, %arg1: i32) -> (i32, i32) {
    %c0_i32 = arith.constant 0 : i32
    %c0_i32_0 = arith.constant 0 : i32
    return %arg0, %c0_i32 : i32, i32
  }
  func.func @transform_1(%arg0: i32, %arg1: i32) -> (i32, i32) {
    %c0_i32 = arith.constant 0 : i32
    %c0_i32_0 = arith.constant 0 : i32
    return %arg1, %c0_i32 : i32, i32
  }
  func.func @transform_2(%arg0: i32, %arg1: i32) -> (i32, i32) {
    %c0_i32 = arith.constant 0 : i32
    %c0_i32_0 = arith.constant 0 : i32
    return %c0_i32, %arg1 : i32, i32
  }
  func.func @transform_3(%arg0: i32, %arg1: i32) -> (i32, i32) {
    %c0_i32 = arith.constant 0 : i32
    %c0_i32_0 = arith.constant 0 : i32
    return %c0_i32, %arg1 : i32, i32
  }
  func.func @transform_4(%arg0: i32, %arg1: i32) -> (i32, i32) {
    %c0_i32 = arith.constant 0 : i32
    %c0_i32_0 = arith.constant 0 : i32
    %c0_i32_1 = arith.constant 0 : i32
    return %c0_i32, %c0_i32_0 : i32, i32
  }
  func.func @transform_5(%arg0: i32, %arg1: i32) -> (i32, i32) {
    %c0_i32 = arith.constant 0 : i32
    %c0_i32_0 = arith.constant 0 : i32
    return %arg0, %c0_i32 : i32, i32
  }
}

</mosaic_0001>

<bundles_post_ra>
// kernel: mlp_forward.1
= control target key start
LH: loop header
LB: loop body
LE: loop exit
PB: predicated region body
PF: predicated region fallthrough
CT: control target
= control target key end

     0   :  { %s301_s1 = inlined_call_operand.vmem [shape: f32[128,128], index: 1, kind: input, shape index: {}]   ;;  %s302_s2 = inlined_call_operand.vmem [shape: f32[1,128], index: 2, kind: input, shape index: {}]   ;;  %s303_s3 = inlined_call_operand.vmem [shape: f32[128,128], index: 3, kind: input, shape index: {}]   ;;  %s304_s0 = inlined_call_operand.vmem [shape: f32[16,128], index: 0, kind: input, shape index: {}]   ;;  %s305_s4 = inlined_call_operand.vmem [shape: f32[1,128], index: 4, kind: input, shape index: {}]   ;;  %s306_s5 = inlined_call_operand.vmem [shape: f32[16,128], index: 5, kind: output, shape index: {}]  }
   0x1   :  { %v43_v0 = vld [vmem:[%s301_s1 + $0x70] sm:$0xff]  ;;  %v44_v1 = vld [vmem:[%s301_s1 + $0x78] sm:$0xff]  ;;  %v41_v3 = vld [vmem:[%s301_s1 + $0x60] sm:$0xff] }
   0x2   :  { %v52_v2 = vpack.c.bf16 %v44_v1, %v43_v0  ;;  %v42_v4 = vld [vmem:[%s301_s1 + $0x68] sm:$0xff]  ;;  %v39_v6 = vld [vmem:[%s301_s1 + $0x50] sm:$0xff]  ;;  %v40_v7 = vld [vmem:[%s301_s1 + $0x58] sm:$0xff] }
   0x3   :  { %v51_v5 = vpack.c.bf16 %v42_v4, %v41_v3  ;;  %v50_v8 = vpack.c.bf16 %v40_v7, %v39_v6  ;;  %v37_v9 = vld [vmem:[%s301_s1 + $0x40] sm:$0xff]  ;;  %v38_v10 = vld [vmem:[%s301_s1 + $0x48] sm:$0xff]  ;;  %v35_v12 = vld [vmem:[%s301_s1 + $0x30] sm:$0xff] }
   0x4   :  { %57 = vmatpush.bf16.xpose.msra.mxu0 %v52_v2  ;;  %v49_v11 = vpack.c.bf16 %v38_v10, %v37_v9  ;;  %v36_v13 = vld [vmem:[%s301_s1 + $0x38] sm:$0xff]  ;;  %v103_v15 = vld [vmem:[%s303_s3 + $0x70] sm:$0xff]  ;;  %v33_v18 = vld [vmem:[%s301_s1 + $0x20] sm:$0xff] }
   0x5   :  { %v48_v14 = vpack.c.bf16 %v36_v13, %v35_v12  ;;  %v104_v16 = vld [vmem:[%s303_s3 + $0x78] sm:$0xff]  ;;  %v34_v19 = vld [vmem:[%s301_s1 + $0x28] sm:$0xff]  ;;  %v101_v20 = vld [vmem:[%s303_s3 + $0x60] sm:$0xff] }
   0x6   :  { %v112_v17 = vpack.c.bf16 %v104_v16, %v103_v15  ;;  %v102_v21 = vld [vmem:[%s303_s3 + $0x68] sm:$0xff]  ;;  %v47_v22 = vpack.c.bf16 %v34_v19, %v33_v18  ;;  %v31_v24 = vld [vmem:[%s301_s1 + $0x10] sm:$0xff]  ;;  %v32_v25 = vld [vmem:[%s301_s1 + $0x18] sm:$0xff] }
   0x7   :  { %v111_v23 = vpack.c.bf16 %v102_v21, %v101_v20  ;;  %v99_v26 = vld [vmem:[%s303_s3 + $0x50] sm:$0xff]  ;;  %v100_v27 = vld [vmem:[%s303_s3 + $0x58] sm:$0xff]  ;;  %v46_v28 = vpack.c.bf16 %v32_v25, %v31_v24  ;;  %v29_v30 = vld [vmem:[%s301_s1] sm:$0xff] }
   0x8   :  { %116 = vmatpush.bf16.xpose.msra.mxu1 %v112_v17  ;;  %v110_v29 = vpack.c.bf16 %v100_v27, %v99_v26  ;;  %v30_v31 = vld [vmem:[%s301_s1 + $0x8] sm:$0xff]  ;;  %v97_v32 = vld [vmem:[%s303_s3 + $0x40] sm:$0xff]  ;;  %v95_v39 = vld [vmem:[%s303_s3 + $0x30] sm:$0xff] }
   0x9   :  { %v98_v33 = vld [vmem:[%s303_s3 + $0x48] sm:$0xff]  ;;  %v45_v34 = vpack.c.bf16 %v30_v31, %v29_v30  ;;  %v26_v36 = vld [vmem:[%s304_s0] sm:$0xff]  ;;  %v96_v40 = vld [vmem:[%s303_s3 + $0x38] sm:$0xff] }
   0xa   :  { %v109_v35 = vpack.c.bf16 %v98_v33, %v97_v32  ;;  %v27_v37 = vld [vmem:[%s304_s0 + $0x8] sm:$0xff]  ;;  %v108_v41 = vpack.c.bf16 %v96_v40, %v95_v39  ;;  %v93_v42 = vld [vmem:[%s303_s3 + $0x20] sm:$0xff]  ;;  %v91_v45 = vld [vmem:[%s303_s3 + $0x10] sm:$0xff] }
   0xb   :  { %v28_v38 = vpack.c.bf16 %v27_v37, %v26_v36  ;;  %v94_v43 = vld [vmem:[%s303_s3 + $0x28] sm:$0xff]  ;;  %v92_v46 = vld [vmem:[%s303_s3 + $0x18] sm:$0xff]  ;;  %v89_v48 = vld [vmem:[%s303_s3] sm:$0xff] }
   0xc   :  { %58 = vmatpush.bf16.xpose.msra.mxu0 %v51_v5  ;;  %v107_v44 = vpack.c.bf16 %v94_v43, %v93_v42  ;;  %v106_v47 = vpack.c.bf16 %v92_v46, %v91_v45  ;;  %v90_v49 = vld [vmem:[%s303_s3 + $0x8] sm:$0xff]  ;;  %v151_v51 = vld [vmem:[%s302_s2] ss:$0 sm:$0xff] }
   0xd   :  { %v105_v50 = vpack.c.bf16 %v90_v49, %v89_v48 }
  0x10   :  { %117 = vmatpush.bf16.xpose.msra.mxu1 %v111_v23 }
  0x14   :  { %59 = vmatpush.bf16.xpose.msra.mxu0 %v50_v8 }
  0x18   :  { %118 = vmatpush.bf16.xpose.msra.mxu1 %v110_v29 }
  0x1c   :  { %60 = vmatpush.bf16.xpose.msra.mxu0 %v49_v11  ;;  %v152_v11 = vld [vmem:[%s305_s4] ss:$0 sm:$0xff] }
  0x20   :  { %119 = vmatpush.bf16.xpose.msra.mxu1 %v109_v35 }
  0x24   :  { %61 = vmatpush.bf16.xpose.msra.mxu0 %v48_v14 }
  0x28   :  { %120 = vmatpush.bf16.xpose.msra.mxu1 %v108_v41 }
  0x2c   :  { %62 = vmatpush.bf16.xpose.msra.mxu0 %v47_v22 }
  0x30   :  { %121 = vmatpush.bf16.xpose.msra.mxu1 %v107_v44 }
  0x34   :  { %63 = vmatpush.bf16.xpose.msra.mxu0 %v46_v28 }
  0x38   :  { %122 = vmatpush.bf16.xpose.msra.mxu1 %v106_v47 }
  0x3c   :  { %64 = vmatpush.bf16.xpose.msra.mxu0 %v45_v34 }
  0x40   :  { %123 = vmatpush.bf16.xpose.msra.mxu1 %v105_v50 }
  0x43   :  { %65 = vmatmul.bf16.vlgmr.msra.gmra.mxu0 %v28_v38 }
  0xc0   :  { %v66_v52 = vpop.f32.mrf.mxu0 }
  0xc1   :  { %v67_v53 = vadd.f32 %v151_v51, %v66_v52 }
  0xc3   :  { %v73_v54 = vmul.f32 %v67_v53, %v67_v53  ;;  %v71_v5 = vmul.f32 0.5, %v67_v53 }
  0xc5   :  { %v75_v55 = vmul.f32 %v73_v54, %v67_v53 }
  0xc7   :  { %v77_v56 = vmul.f32 0.044715, %v75_v55 }
  0xc8   :  { %v68_v57 = vpop.f32.mrf.mxu0 }
  0xc9   :  { %v69_v58 = vadd.f32 %v151_v51, %v68_v57  ;;  %v79_v59 = vadd.f32 %v77_v56, %v67_v53 }
  0xcb   :  { %v74_v60 = vmul.f32 %v69_v58, %v69_v58  ;;  %v81_v62 = vmul.f32 0.7978846, %v79_v59  ;;  %v72_v6 = vmul.f32 0.5, %v69_v58 }
  0xcd   :  { %v76_v61 = vmul.f32 %v74_v60, %v69_v58  ;;  %153 = vtanh.f32 %v81_v62 }
  0xcf   :  { %v78_v63 = vmul.f32 0.044715, %v76_v61 }
  0xd1   :  { %v80_v0 = vadd.f32 %v78_v63, %v69_v58 }
  0xd3   :  { %v82_v1 = vmul.f32 0.7978846, %v80_v0  ;;  %v154_v2 = vpop.eup %153 }
  0xd4   :  { %v85_v3 = vadd.f32 1.0, %v154_v2 }
  0xd5   :  { %155 = vtanh.f32 %v82_v1 }
  0xd6   :  { %v87_v8 = vmul.f32 %v85_v3, %v71_v5 }
  0xdb   :  { %v156_v4 = vpop.eup %155 }
  0xdc   :  { %v86_v7 = vadd.f32 1.0, %v156_v4 }
  0xde   :  { %v88_v9 = vmul.f32 %v86_v7, %v72_v6 }
  0xe0   :  { %v115_v10 = vpack.c.bf16 %v88_v9, %v87_v8 }
  0xe2   :  { %124 = vmatmul.bf16.vlgmr.msra.gmra.mxu1 %v115_v10 }
 0x15f   :  { %v125_v12 = vpop.f32.mrf.mxu1 }
 0x160   :  { %v143_v13 = vadd.f32 %v152_v11, %v125_v12 }
 0x162   :  { %145 = vst [vmem:[%s306_s5] sm:$0xff] %v143_v13 }
 0x167   :  { %v127_v14 = vpop.f32.mrf.mxu1 }
 0x168   :  { %v144_v15 = vadd.f32 %v152_v11, %v127_v14 }
 0x16a   :  { %146 = vst [vmem:[%s306_s5 + $0x8] sm:$0xff] %v144_v15 }

</bundles_post_ra>
